<compile_context>
chip_gen: v5e
topology: v5e:2x2
jax: 0.10.0
libtpu: 0.0.40
codegen_flags: <defaults>
</compile_context>

<pallas_src>
import functools

import jax
import jax.numpy as jnp
from jax import lax
from jax.experimental import pallas as pl
from jax.experimental.pallas import tpu as pltpu

_MIB = 1024 * 1024
_HAS_BUFFERED = hasattr(pl, "Buffered")  # feature check for pipeline_mode=pl.Buffered(1)


# --------------------------------------------------------------------------------------
# VMEM budgeting helpers (generation-aware)
# --------------------------------------------------------------------------------------
def _ceil_to(x, m):
    return ((x + m - 1) // m) * m


def _vmem_block_bytes(shape, dtype):
    """Approximate VMEM footprint of one buffer incl. (sublane, lane) tile padding."""
    e = jnp.dtype(dtype).itemsize
    sub = 8 * max(1, 4 // e)              # packed sublane rows: 8 (f32) / 16 (bf16)
    if len(shape) == 1:
        return _ceil_to(int(shape[0]), 128) * e
    lead = 1
    for d in shape[:-2]:
        lead *= int(d)
    return lead * _ceil_to(int(shape[-2]), sub) * _ceil_to(int(shape[-1]), 128) * e


def _vmem_capacity_bytes():
    """Physical VMEM per core; conservative 64 MiB (v7x) if the query is unavailable."""
    try:  # hardware query only -- a failure here never masks a kernel build error
        info = pltpu.get_tpu_info()
        for name in ("vmem_capacity_bytes", "vmem_bytes", "vmem_size_bytes"):
            v = getattr(info, name, None)
            if v:
                return int(v)
    except Exception:
        pass
    return 64 * _MIB


def _estimate_vmem(S, D, H, dk, tq, x_dtype, cdt, hoist_bias, const_bufs):
    """Conservative per-core VMEM estimate (blocks + persistent scratch + transients)."""
    d_inner = H * dk
    total = 0
    total += 2 * _vmem_block_bytes((S, D), x_dtype)            # x_full (double-buffered)
    total += 2 * _vmem_block_bytes((tq, D), x_dtype)           # out    (double-buffered)
    if hoist_bias:
        total += const_bufs * _vmem_block_bytes((H, S, S), cdt)
    else:
        total += 2 * _vmem_block_bytes((H, tq, S), cdt)
    total += const_bufs * (_vmem_block_bytes((1, D), jnp.float32)
                           + _vmem_block_bytes((D, d_inner), cdt)
                           + _vmem_block_bytes((2 * d_inner, D), cdt)
                           + _vmem_block_bytes((H, dk, D), cdt))
    # persistent head-major scratch (only Q is lane-padded when d_kv < 128)
    total += _vmem_block_bytes((H, S, dk), cdt)
    total += 2 * _vmem_block_bytes((H, dk, S), cdt)
    # transient peak: projection phase (qt == 0) vs attention phase
    proj = (2 * _vmem_block_bytes((S, D), jnp.float32)
            + _vmem_block_bytes((S, d_inner), jnp.float32)
            + _vmem_block_bytes((2 * d_inner, S), jnp.float32))
    attn = (2 * _vmem_block_bytes((H, tq, S), jnp.float32)     # scores + p (fp32)
            + _vmem_block_bytes((H, tq, dk), jnp.float32)      # ctx
            + _vmem_block_bytes((tq, D), jnp.float32))         # output-proj accumulator
    total += max(proj, attn)
    return total


def _pick_q_tile(S, D, H, dk, x_dtype, cdt, budget, const_bufs, q_block=None):
    """Largest q-tile (multiple of 16 dividing S, <= 512) whose VMEM estimate fits."""
    if q_block is not None:
        return q_block
    cands = []
    if S <= 512 or S % 16 != 0:
        cands.append(S)
    t = min(512, S - S % 16)
    while t >= 16:
        if S % t == 0:
            cands.append(t)
        t -= 16
    if not cands:
        cands = [S]
    cands = sorted(set(cands), reverse=True)
    for t in cands:
        if _estimate_vmem(S, D, H, dk, t, x_dtype, cdt, False, const_bufs) <= budget:
            return t
    return cands[-1]
    # TODO(synk): for very long S that still overflows VMEM, switch the softmax to an
    # online (flash-style) inner KV loop instead of shrinking tq further.


# --------------------------------------------------------------------------------------
# Kernel
# --------------------------------------------------------------------------------------
def _t5_self_attention_kernel(x_ref, bias_ref, ln_w_ref, wq_ref, wkv_t_ref, wo_ref,
                              out_ref, q_sc, k_sc, v_sc,
                              *, num_heads, d_kv, eps, bias_is_full):
    H, dk = num_heads, d_kv
    d_inner = H * dk
    S = x_ref.shape[1]
    D = x_ref.shape[2]
    tq = out_ref.shape[1]
    cdt = q_sc.dtype                       # MXU compute dtype (bf16 by default)
    qt = pl.program_id(1)

    # ---- once per batch element: RMS-norm full sequence + Q / (K,V)^T projections ----
    @pl.when(qt == 0)
    def _project_qkv():
        x = x_ref[0].astype(jnp.float32)                                   # (S, D)
        var = jnp.mean(x * x, axis=-1, keepdims=True)
        normed = (x * lax.rsqrt(var + eps)
                  * ln_w_ref[0].astype(jnp.float32)).astype(cdt)           # (S, D)
        # Q in (H, S, dk) (head-major, reused by every q tile).
        q = jnp.dot(normed, wq_ref[...],
                    preferred_element_type=jnp.float32).astype(cdt)        # (S, d_inner)
        q_sc[...] = jnp.transpose(q.reshape(S, H, dk), (1, 0, 2))
        # K, V produced directly in lane-dense (H, dk, S) layout via a
        # weight-transposed matmul: contract over D (last dim of both operands).
        kv_t = lax.dot_general(wkv_t_ref[...], normed,
                               (((1,), (1,)), ((), ())),
                               preferred_element_type=jnp.float32).astype(cdt)
        k_sc[...] = kv_t[:d_inner].reshape(H, dk, S)                       # free split
        v_sc[...] = kv_t[d_inner:].reshape(H, dk, S)

    # ---- per q-tile attention (head-batched, lane-dense scores) ----
    q_start = pl.multiple_of(qt * tq, tq)
    qh = q_sc[:, pl.ds(q_start, tq), :]                                    # (H, tq, dk)

    scores = jnp.einsum("hqd,hds->hqs", qh, k_sc[...],
                        preferred_element_type=jnp.float32)                # (H, tq, S)
    if bias_is_full:
        bias_tile = bias_ref[0, :, pl.ds(q_start, tq), :]
    else:
        bias_tile = bias_ref[0]
    scores = scores + bias_tile.astype(jnp.float32)
    scores = scores - jnp.max(scores, axis=-1, keepdims=True)
    p = jnp.exp(scores)                                                    # fp32 exp (v5e-safe)
    p = p * pl.reciprocal(jnp.sum(p, axis=-1, keepdims=True), approx=True)

    ctx = jnp.einsum("hqs,hds->hqd", p.astype(cdt), v_sc[...],
                     preferred_element_type=jnp.float32).astype(cdt)       # (H, tq, dk)

    # Output projection without the (H,tq,dk)->(tq,d_inner) relayout: per-head MXU
    # matmuls against Wo[h] (dk, D), accumulated in fp32 on the VPU (static unroll).
    attn_out = jnp.zeros((tq, D), jnp.float32)
    for h in range(H):
        attn_out = attn_out + jnp.dot(ctx[h], wo_ref[h],
                                      preferred_element_type=jnp.float32)

    # Residual: re-read the q tile from the already-resident full-sequence block.
    x_tile = x_ref[0, pl.ds(q_start, tq), :].astype(jnp.float32)
    out_ref[0] = (x_tile + attn_out).astype(out_ref.dtype)


# --------------------------------------------------------------------------------------
# Wrapper
# --------------------------------------------------------------------------------------
def prepare_switch_attention_params(params, encoder_position_bias, *, num_heads, d_kv,
                                    compute_dtype=jnp.bfloat16):
    """One-time (out of the hot path) weight fusion / layout / dtype preparation."""
    D = params["wq"].shape[0]
    H, dk = num_heads, d_kv
    return {
        "wq": params["wq"].astype(compute_dtype),                               # (D, H*dk)
        "wkv_t": jnp.concatenate([params["wk"], params["wv"]],
                                 axis=1).T.astype(compute_dtype),               # (2*H*dk, D)
        "wo_hd": params["wo"].reshape(H, dk, D).astype(compute_dtype),          # (H, dk, D)
        "ln_w": params["ln_w"].reshape(1, D).astype(jnp.float32),               # (1, D)
        "bias": encoder_position_bias.astype(compute_dtype),                    # (1|B,H,S,S)
    }


def switch_encoder_block_pipe(encoder_hidden_states, encoder_position_bias,
                              extended_encoder_attention_mask, decoder_input_ids,
                              decoder_attention_mask, encoder_attention_mask,
                              params, *, num_heads, d_kv, eps=1e-6,
                              compute_dtype=jnp.bfloat16, q_block=None, prepared=None):
    # NOTE: like HF T5 encoder layers, any attention mask is assumed folded into
    # encoder_position_bias by the caller; the mask tensors are only passed through.
    # TODO(synk): on-the-fly relative position bias (has_relative_attention_bias=True
    # with encoder_position_bias=None) is not implemented; the bias tensor is required.
    x = encoder_hidden_states
    B, S, D = x.shape
    H, dk = num_heads, d_kv
    d_inner = H * dk
    assert D % 128 == 0, "pad d_model to a multiple of 128 for lane-dense stores"
    assert params["wq"].shape == (D, d_inner)
    assert encoder_position_bias.shape[1] == H
    assert encoder_position_bias.shape[-2:] == (S, S)

    if prepared is None:  # convenience path; callers should hoist this out of the hot loop
        prepared = prepare_switch_attention_params(
            params, encoder_position_bias, num_heads=H, d_kv=dk,
            compute_dtype=compute_dtype)
    wq, wkv_t, wo_hd = prepared["wq"], prepared["wkv_t"], prepared["wo_hd"]
    ln_w, bias = prepared["ln_w"], prepared["bias"]
    cdt = wq.dtype
    bias_batched = bias.shape[0] != 1

    # ---- generation-aware VMEM budget / tiling ----
    vmem_cap = _vmem_capacity_bytes()
    if vmem_cap <= 64 * _MIB:                       # v7x: leave compiler headroom
        vmem_limit = max(vmem_cap - 8 * _MIB, 32 * _MIB)
    else:                                           # v5e / v6e (128 MiB physical)
        vmem_limit = min(100 * _MIB, vmem_cap - 16 * _MIB)
    budget = vmem_limit - 4 * _MIB
    const_bufs = 1 if _HAS_BUFFERED else 2

    tq = _pick_q_tile(S, D, H, dk, x.dtype, cdt, budget, const_bufs, q_block)
    assert S % tq == 0 and (tq % 16 == 0 or tq == S)
    n_qt = S // tq

    # Hoist the full position bias (one fetch per call, not per batch element) when it
    # fits and is batch-broadcast; otherwise tile it over q (re-fetched per batch).
    hoist_bias = (not bias_batched) and (
        _estimate_vmem(S, D, H, dk, tq, x.dtype, cdt, True, const_bufs) <= budget)

    kernel = functools.partial(_t5_self_attention_kernel, num_heads=H, d_kv=dk,
                               eps=eps, bias_is_full=hoist_bias)

    def const_spec(shape):
        idx = lambda b, q: (0,) * len(shape)
        if _HAS_BUFFERED:
            return pl.BlockSpec(shape, idx, pipeline_mode=pl.Buffered(1))
        return pl.BlockSpec(shape, idx)

    if hoist_bias:
        bias_spec = const_spec((1, H, S, S))
    elif bias_batched:
        bias_spec = pl.BlockSpec((1, H, tq, S), lambda b, q: (b, 0, q, 0))
    else:
        bias_spec = pl.BlockSpec((1, H, tq, S), lambda b, q: (0, 0, q, 0))

    # ---- cost estimate for XLA scheduling around the pipe stage ----
    bias_reads = 1 if (hoist_bias or bias_batched) else B
    flops = (2 * B * S * D * 3 * d_inner          # QKV projections
             + 4 * B * H * S * S * dk             # QK^T and PV
             + 2 * B * S * d_inner * D)           # output projection
    bytes_accessed = (x.size * x.dtype.itemsize                     # x read once
                      + x.size * x.dtype.itemsize                   # out written once
                      + bias_reads * bias.size * bias.dtype.itemsize
                      + (wq.size + wkv_t.size + wo_hd.size) * wq.dtype.itemsize
                      + ln_w.size * 4)
    cost = pl.CostEstimate(flops=int(flops), transcendentals=int(B * H * S * S),
                           bytes_accessed=int(bytes_accessed))

    out = pl.pallas_call(
        kernel,
        out_shape=jax.ShapeDtypeStruct((B, S, D), x.dtype),
        grid=(B, n_qt),
        in_specs=[
            pl.BlockSpec((1, S, D), lambda b, q: (b, 0, 0)),        # full seq (K/V + residual)
            bias_spec,                                              # position bias
            const_spec((1, D)),                                     # layernorm weight
            const_spec((D, d_inner)),                               # Wq
            const_spec((2 * d_inner, D)),                           # [Wk|Wv]^T
            const_spec((H, dk, D)),                                 # Wo (head-major)
        ],
        out_specs=pl.BlockSpec((1, tq, D), lambda b, q: (b, q, 0)),
        scratch_shapes=[
            pltpu.VMEM((H, S, dk), cdt),    # Q  (head-major)
            pltpu.VMEM((H, dk, S), cdt),    # K^T (lane-dense)
            pltpu.VMEM((H, dk, S), cdt),    # V^T (lane-dense)
        ],
        compiler_params=pltpu.CompilerParams(
            # K/V scratch is produced at qt == 0, so the q axis must stay sequential
            # per batch element ("arbitrary"); only the batch axis is parallel.
            # TODO(synk): for B == 1 workloads on v7x, split the projection into its own
            # pallas_call so a q-axis factor can be parallel across the two cores.
            dimension_semantics=("parallel", "arbitrary"),
            vmem_limit_bytes=int(vmem_limit)),
        cost_estimate=cost,
    )(x, bias, ln_w, wq, wkv_t, wo_hd)

    # Pipe-stage tuple passthrough (matches the PyTorch forward signature).
    return (out, encoder_position_bias, extended_encoder_attention_mask,
            decoder_input_ids, decoder_attention_mask, encoder_attention_mask)


# --------------------------------------------------------------------------------------
# Pure-JAX reference and demo
# --------------------------------------------------------------------------------------
def _reference(x, bias, params, num_heads, d_kv, eps=1e-6):
    B, S, D = x.shape
    xf = x.astype(jnp.float32)
    var = jnp.mean(xf * xf, axis=-1, keepdims=True)
    normed = xf * lax.rsqrt(var + eps) * params["ln_w"].reshape(-1)
    q = (normed @ params["wq"]).reshape(B, S, num_heads, d_kv).transpose(0, 2, 1, 3)
    k = (normed @ params["wk"]).reshape(B, S, num_heads, d_kv).transpose(0, 2, 1, 3)
    v = (normed @ params["wv"]).reshape(B, S, num_heads, d_kv).transpose(0, 2, 1, 3)
    scores = jnp.einsum("bhqd,bhkd->bhqk", q, k) + bias
    p = jax.nn.softmax(scores, axis=-1)
    ctx = jnp.einsum("bhqk,bhkd->bhqd", p, v).transpose(0, 2, 1, 3).reshape(B, S, -1)
    return (xf + ctx @ params["wo"]).astype(x.dtype)


if __name__ == "__main__":
    B, S, D = 2, 8, 128          # batch, seq, d_model (lane-dense: D % 128 == 0)
    H, DK = 4, 32                # num_heads, d_kv  (inner_dim = H*DK = 128)
    eps = 1e-6

    key = jax.random.PRNGKey(0)
    keys = jax.random.split(key, 8)

    x = jax.random.normal(keys[0], (B, S, D), dtype=jnp.float32)
    pos_bias = 0.1 * jax.random.normal(keys[1], (1, H, S, S), dtype=jnp.float32)

    params = {
        "ln_w": jnp.ones((1, D), dtype=jnp.float32) +
                0.01 * jax.random.normal(keys[2], (1, D), dtype=jnp.float32),
        "wq": 0.05 * jax.random.normal(keys[3], (D, H * DK), dtype=jnp.float32),
        "wk": 0.05 * jax.random.normal(keys[4], (D, H * DK), dtype=jnp.float32),
        "wv": 0.05 * jax.random.normal(keys[5], (D, H * DK), dtype=jnp.float32),
        "wo": 0.05 * jax.random.normal(keys[6], (H * DK, D), dtype=jnp.float32),
    }

    # Pass-through pipe tensors.
    extended_mask = jnp.zeros((B, 1, 1, S), dtype=jnp.float32)
    decoder_input_ids = jax.random.randint(keys[7], (B, S), 0, 100, dtype=jnp.int32)
    decoder_attention_mask = jnp.ones((B, S), dtype=jnp.int32)
    encoder_attention_mask = jnp.ones((B, S), dtype=jnp.int32)

    # Hoist the weight fusion / bf16 casts out of the hot path (done once).
    prepared = prepare_switch_attention_params(params, pos_bias, num_heads=H, d_kv=DK)

    outs = switch_encoder_block_pipe(
        x, pos_bias, extended_mask, decoder_input_ids,
        decoder_attention_mask, encoder_attention_mask,
        params, num_heads=H, d_kv=DK, eps=eps, prepared=prepared)
    out = jax.block_until_ready(outs[0])

    ref = _reference(x, pos_bias, params, H, DK, eps)
    max_err = float(jnp.max(jnp.abs(out - ref)))
    assert out.shape == ref.shape
    # bf16 MXU operands + approx reciprocal => loosened (but still tight) tolerance.
    assert jnp.allclose(out, ref, rtol=2e-2, atol=2e-2), \
        f"mismatch vs JAX reference (max abs err {max_err})"
    # Pass-through tensors must be returned unchanged.
    assert outs[1] is pos_bias and outs[3] is decoder_input_ids

    print("KERNEL_OK")
</pallas_src>

<mosaic_0001>
module attributes {stable_mosaic.version = 11 : i64} {
  func.func @_t5_self_attention_kernel(%arg0: i32, %arg1: i32, %arg2: memref<1x8x128xf32, #tpu.memory_space<vmem>>, %arg3: memref<1x4x8x8xbf16, #tpu.memory_space<vmem>>, %arg4: memref<1x128xf32, #tpu.memory_space<vmem>>, %arg5: memref<128x128xbf16, #tpu.memory_space<vmem>>, %arg6: memref<256x128xbf16, #tpu.memory_space<vmem>>, %arg7: memref<4x32x128xbf16, #tpu.memory_space<vmem>>, %arg8: memref<1x8x128xf32, #tpu.memory_space<vmem>>, %arg9: memref<4x8x32xbf16, #tpu.memory_space<vmem>>, %arg10: memref<4x32x8xbf16, #tpu.memory_space<vmem>>, %arg11: memref<4x32x8xbf16, #tpu.memory_space<vmem>>) attributes {dimension_semantics = [#tpu.dimension_semantics<parallel>, #tpu.dimension_semantics<arbitrary>], iteration_bounds = array<i64: 2, 1>, scalar_prefetch = 0 : i64, scratch_operands = 3 : i64, tpu.core_type = #tpu.core_type<tc>, window_params = [{transform_indices = @transform_0, window_bounds = array<i64: 1, 8, 128>}, {pipeline_mode = #tpu.pipeline_mode<synchronous>, transform_indices = @transform_1, window_bounds = array<i64: 1, 4, 8, 8>}, {pipeline_mode = #tpu.pipeline_mode<synchronous>, transform_indices = @transform_2, window_bounds = array<i64: 1, 128>}, {pipeline_mode = #tpu.pipeline_mode<synchronous>, transform_indices = @transform_3, window_bounds = array<i64: 128, 128>}, {pipeline_mode = #tpu.pipeline_mode<synchronous>, transform_indices = @transform_4, window_bounds = array<i64: 256, 128>}, {pipeline_mode = #tpu.pipeline_mode<synchronous>, transform_indices = @transform_5, window_bounds = array<i64: 4, 32, 128>}, {transform_indices = @transform_6, window_bounds = array<i64: 1, 8, 128>}]} {
    %c0_i32 = arith.constant 0 : i32
    %0 = arith.cmpi eq, %arg1, %c0_i32 : i32
    %1 = arith.extui %0 : i1 to i32
    %c0_i32_0 = arith.constant 0 : i32
    %2 = arith.cmpi ne, %1, %c0_i32_0 : i32
    scf.if %2 {
      %c0_33 = arith.constant 0 : index
      %c0_34 = arith.constant 0 : index
      %c0_35 = arith.constant 0 : index
      %60 = vector.load %arg2[%c0_33, %c0_34, %c0_35] : memref<1x8x128xf32, #tpu.memory_space<vmem>>, vector<1x8x128xf32>
      %61 = vector.shape_cast %60 : vector<1x8x128xf32> to vector<8x128xf32>
      %62 = arith.mulf %61, %61 : vector<8x128xf32>
      %cst_36 = arith.constant dense<0.000000e+00> : vector<8xf32>
      %63 = vector.multi_reduction <add>, %62, %cst_36 [1] : vector<8x128xf32> to vector<8xf32>
      %64 = vector.shape_cast %63 : vector<8xf32> to vector<8x1xf32>
      %cst_37 = arith.constant 1.280000e+02 : f32
      %65 = vector.broadcast %cst_37 : f32 to vector<8x1xf32>
      %66 = arith.divf %64, %65 : vector<8x1xf32>
      %cst_38 = arith.constant 9.99999997E-7 : f32
      %67 = vector.broadcast %cst_38 : f32 to vector<8x1xf32>
      %68 = arith.addf %66, %67 : vector<8x1xf32>
      %69 = math.rsqrt %68 : vector<8x1xf32>
      %70 = vector.broadcast %69 : vector<8x1xf32> to vector<8x128xf32>
      %71 = arith.mulf %61, %70 : vector<8x128xf32>
      %c0_39 = arith.constant 0 : index
      %c0_40 = arith.constant 0 : index
      %72 = vector.load %arg4[%c0_39, %c0_40] : memref<1x128xf32, #tpu.memory_space<vmem>>, vector<1x128xf32>
      %73 = vector.shape_cast %72 : vector<1x128xf32> to vector<128xf32>
      %74 = vector.shape_cast %73 : vector<128xf32> to vector<1x128xf32>
      %75 = vector.broadcast %74 : vector<1x128xf32> to vector<8x128xf32>
      %76 = arith.mulf %71, %75 : vector<8x128xf32>
      %77 = arith.truncf %76 : vector<8x128xf32> to vector<8x128xbf16>
      %c0_41 = arith.constant 0 : index
      %c0_42 = arith.constant 0 : index
      %78 = vector.load %arg5[%c0_41, %c0_42] : memref<128x128xbf16, #tpu.memory_space<vmem>>, vector<128x128xbf16>
      %cst_43 = arith.constant dense<0.000000e+00> : vector<8x128xf32>
      %79 = tpu.matmul %77, %78, %cst_43 {dimension_numbers = #tpu.dot_dimension_numbers<[1], [0], [0], [1], [0, 0, 1, 1], [], []>} : vector<8x128xbf16>, vector<128x128xbf16>, vector<8x128xf32> -> vector<8x128xf32>
      %80 = arith.truncf %79 : vector<8x128xf32> to vector<8x128xbf16>
      %81 = vector.shape_cast %80 : vector<8x128xbf16> to vector<8x4x32xbf16>
      %82 = tpu.transpose %81, [1, 0, 2] : vector<8x4x32xbf16> -> vector<4x8x32xbf16>
      %c0_44 = arith.constant 0 : index
      %c0_45 = arith.constant 0 : index
      %c0_46 = arith.constant 0 : index
      %83 = vector.load %arg9[%c0_44, %c0_45, %c0_46] : memref<4x8x32xbf16, #tpu.memory_space<vmem>>, vector<4x8x32xbf16>
      tpu.vector_store %arg9[%c0_44, %c0_45, %c0_46], %82 {strides = array<i32>} : memref<4x8x32xbf16, #tpu.memory_space<vmem>>, vector<4x8x32xbf16>,
      %c0_47 = arith.constant 0 : index
      %c0_48 = arith.constant 0 : index
      %84 = vector.load %arg6[%c0_47, %c0_48] : memref<256x128xbf16, #tpu.memory_space<vmem>>, vector<256x128xbf16>
      %cst_49 = arith.constant dense<0.000000e+00> : vector<256x8xf32>
      %85 = tpu.matmul %84, %77, %cst_49 {dimension_numbers = #tpu.dot_dimension_numbers<[1], [1], [0], [0], [0, 0, 1, 0], [], []>} : vector<256x128xbf16>, vector<8x128xbf16>, vector<256x8xf32> -> vector<256x8xf32>
      %86 = arith.truncf %85 : vector<256x8xf32> to vector<256x8xbf16>
      %87 = vector.extract_strided_slice %86 {offsets = [0, 0], sizes = [128, 8], strides = [1, 1]} : vector<256x8xbf16> to vector<128x8xbf16>
      %88 = vector.shape_cast %87 : vector<128x8xbf16> to vector<4x32x8xbf16>
      %c0_50 = arith.constant 0 : index
      %c0_51 = arith.constant 0 : index
      %c0_52 = arith.constant 0 : index
      %89 = vector.load %arg10[%c0_50, %c0_51, %c0_52] : memref<4x32x8xbf16, #tpu.memory_space<vmem>>, vector<4x32x8xbf16>
      tpu.vector_store %arg10[%c0_50, %c0_51, %c0_52], %88 {strides = array<i32>} : memref<4x32x8xbf16, #tpu.memory_space<vmem>>, vector<4x32x8xbf16>,
      %90 = vector.extract_strided_slice %86 {offsets = [128, 0], sizes = [128, 8], strides = [1, 1]} : vector<256x8xbf16> to vector<128x8xbf16>
      %91 = vector.shape_cast %90 : vector<128x8xbf16> to vector<4x32x8xbf16>
      %c0_53 = arith.constant 0 : index
      %c0_54 = arith.constant 0 : index
      %c0_55 = arith.constant 0 : index
      %92 = vector.load %arg11[%c0_53, %c0_54, %c0_55] : memref<4x32x8xbf16, #tpu.memory_space<vmem>>, vector<4x32x8xbf16>
      tpu.vector_store %arg11[%c0_53, %c0_54, %c0_55], %91 {strides = array<i32>} : memref<4x32x8xbf16, #tpu.memory_space<vmem>>, vector<4x32x8xbf16>,
    } else {
    }
    %c8_i32 = arith.constant 8 : i32
    %3 = arith.muli %arg1, %c8_i32 : i32
    %4 = tpu.assume_multiple %3, 8 : i32
    %c0 = arith.constant 0 : index
    %5 = arith.index_cast %4 : i32 to index
    %c0_1 = arith.constant 0 : index
    %6 = vector.load %arg9[%c0, %5, %c0_1] : memref<4x8x32xbf16, #tpu.memory_space<vmem>>, vector<4x8x32xbf16>
    %c0_2 = arith.constant 0 : index
    %c0_3 = arith.constant 0 : index
    %c0_4 = arith.constant 0 : index
    %7 = vector.load %arg10[%c0_2, %c0_3, %c0_4] : memref<4x32x8xbf16, #tpu.memory_space<vmem>>, vector<4x32x8xbf16>
    "tpu.trace_start"() <{level = 10 : i32, message = "hqd,hds->hqs"}> : () -> ()
    %cst = arith.constant dense<0.000000e+00> : vector<4x8x8xf32>
    %8 = tpu.matmul %6, %7, %cst {dimension_numbers = #tpu.dot_dimension_numbers<[2], [1], [1], [2], [0, 0, 0, 1, 1, 2], [0], [0]>} : vector<4x8x32xbf16>, vector<4x32x8xbf16>, vector<4x8x8xf32> -> vector<4x8x8xf32>
    "tpu.trace_stop"() : () -> ()
    %c0_5 = arith.constant 0 : index
    %c0_6 = arith.constant 0 : index
    %9 = arith.index_cast %4 : i32 to index
    %c0_7 = arith.constant 0 : index
    %10 = vector.load %arg3[%c0_5, %c0_6, %9, %c0_7] : memref<1x4x8x8xbf16, #tpu.memory_space<vmem>>, vector<1x4x8x8xbf16>
    %11 = vector.shape_cast %10 : vector<1x4x8x8xbf16> to vector<4x8x8xbf16>
    %12 = arith.extf %11 : vector<4x8x8xbf16> to vector<4x8x8xf32>
    %13 = arith.addf %8, %12 : vector<4x8x8xf32>
    %cst_8 = arith.constant dense<0xFF800000> : vector<4x8xf32>
    %14 = vector.multi_reduction <maximumf>, %13, %cst_8 [2] : vector<4x8x8xf32> to vector<4x8xf32>
    %15 = vector.shape_cast %14 : vector<4x8xf32> to vector<4x8x1xf32>
    %16 = vector.broadcast %15 : vector<4x8x1xf32> to vector<4x8x8xf32>
    %17 = arith.subf %13, %16 : vector<4x8x8xf32>
    %18 = math.exp %17 : vector<4x8x8xf32>
    %cst_9 = arith.constant dense<0.000000e+00> : vector<4x8xf32>
    %19 = vector.multi_reduction <add>, %18, %cst_9 [2] : vector<4x8x8xf32> to vector<4x8xf32>
    %20 = vector.shape_cast %19 : vector<4x8xf32> to vector<4x8x1xf32>
    %21 = tpu.reciprocal %20 {approx = true} : vector<4x8x1xf32> -> vector<4x8x1xf32>
    %22 = vector.broadcast %21 : vector<4x8x1xf32> to vector<4x8x8xf32>
    %23 = arith.mulf %18, %22 : vector<4x8x8xf32>
    %24 = arith.truncf %23 : vector<4x8x8xf32> to vector<4x8x8xbf16>
    %c0_10 = arith.constant 0 : index
    %c0_11 = arith.constant 0 : index
    %c0_12 = arith.constant 0 : index
    %25 = vector.load %arg11[%c0_10, %c0_11, %c0_12] : memref<4x32x8xbf16, #tpu.memory_space<vmem>>, vector<4x32x8xbf16>
    "tpu.trace_start"() <{level = 10 : i32, message = "hqs,hds->hqd"}> : () -> ()
    %cst_13 = arith.constant dense<0.000000e+00> : vector<4x8x32xf32>
    %26 = tpu.matmul %24, %25, %cst_13 {dimension_numbers = #tpu.dot_dimension_numbers<[2], [2], [1], [1], [0, 0, 0, 1, 1, 1], [0], [0]>} : vector<4x8x8xbf16>, vector<4x32x8xbf16>, vector<4x8x32xf32> -> vector<4x8x32xf32>
    "tpu.trace_stop"() : () -> ()
    %27 = arith.truncf %26 : vector<4x8x32xf32> to vector<4x8x32xbf16>
    %cst_14 = arith.constant 0.000000e+00 : f32
    %28 = vector.broadcast %cst_14 : f32 to vector<8x128xf32>
    %29 = vector.extract_strided_slice %27 {offsets = [0, 0, 0], sizes = [1, 8, 32], strides = [1, 1, 1]} : vector<4x8x32xbf16> to vector<1x8x32xbf16>
    %30 = vector.shape_cast %29 : vector<1x8x32xbf16> to vector<8x32xbf16>
    %c0_15 = arith.constant 0 : index
    %c0_16 = arith.constant 0 : index
    %c0_17 = arith.constant 0 : index
    %31 = vector.load %arg7[%c0_15, %c0_16, %c0_17] : memref<4x32x128xbf16, #tpu.memory_space<vmem>>, vector<1x32x128xbf16>
    %32 = vector.shape_cast %31 : vector<1x32x128xbf16> to vector<32x128xbf16>
    %cst_18 = arith.constant dense<0.000000e+00> : vector<8x128xf32>
    %33 = tpu.matmul %30, %32, %cst_18 {dimension_numbers = #tpu.dot_dimension_numbers<[1], [0], [0], [1], [0, 0, 1, 1], [], []>} : vector<8x32xbf16>, vector<32x128xbf16>, vector<8x128xf32> -> vector<8x128xf32>
    %34 = arith.addf %28, %33 : vector<8x128xf32>
    %35 = vector.extract_strided_slice %27 {offsets = [1, 0, 0], sizes = [1, 8, 32], strides = [1, 1, 1]} : vector<4x8x32xbf16> to vector<1x8x32xbf16>
    %36 = vector.shape_cast %35 : vector<1x8x32xbf16> to vector<8x32xbf16>
    %c1 = arith.constant 1 : index
    %c0_19 = arith.constant 0 : index
    %c0_20 = arith.constant 0 : index
    %37 = vector.load %arg7[%c1, %c0_19, %c0_20] : memref<4x32x128xbf16, #tpu.memory_space<vmem>>, vector<1x32x128xbf16>
    %38 = vector.shape_cast %37 : vector<1x32x128xbf16> to vector<32x128xbf16>
    %cst_21 = arith.constant dense<0.000000e+00> : vector<8x128xf32>
    %39 = tpu.matmul %36, %38, %cst_21 {dimension_numbers = #tpu.dot_dimension_numbers<[1], [0], [0], [1], [0, 0, 1, 1], [], []>} : vector<8x32xbf16>, vector<32x128xbf16>, vector<8x128xf32> -> vector<8x128xf32>
    %40 = arith.addf %34, %39 : vector<8x128xf32>
    %41 = vector.extract_strided_slice %27 {offsets = [2, 0, 0], sizes = [1, 8, 32], strides = [1, 1, 1]} : vector<4x8x32xbf16> to vector<1x8x32xbf16>
    %42 = vector.shape_cast %41 : vector<1x8x32xbf16> to vector<8x32xbf16>
    %c2 = arith.constant 2 : index
    %c0_22 = arith.constant 0 : index
    %c0_23 = arith.constant 0 : index
    %43 = vector.load %arg7[%c2, %c0_22, %c0_23] : memref<4x32x128xbf16, #tpu.memory_space<vmem>>, vector<1x32x128xbf16>
    %44 = vector.shape_cast %43 : vector<1x32x128xbf16> to vector<32x128xbf16>
    %cst_24 = arith.constant dense<0.000000e+00> : vector<8x128xf32>
    %45 = tpu.matmul %42, %44, %cst_24 {dimension_numbers = #tpu.dot_dimension_numbers<[1], [0], [0], [1], [0, 0, 1, 1], [], []>} : vector<8x32xbf16>, vector<32x128xbf16>, vector<8x128xf32> -> vector<8x128xf32>
    %46 = arith.addf %40, %45 : vector<8x128xf32>
    %47 = vector.extract_strided_slice %27 {offsets = [3, 0, 0], sizes = [1, 8, 32], strides = [1, 1, 1]} : vector<4x8x32xbf16> to vector<1x8x32xbf16>
    %48 = vector.shape_cast %47 : vector<1x8x32xbf16> to vector<8x32xbf16>
    %c3 = arith.constant 3 : index
    %c0_25 = arith.constant 0 : index
    %c0_26 = arith.constant 0 : index
    %49 = vector.load %arg7[%c3, %c0_25, %c0_26] : memref<4x32x128xbf16, #tpu.memory_space<vmem>>, vector<1x32x128xbf16>
    %50 = vector.shape_cast %49 : vector<1x32x128xbf16> to vector<32x128xbf16>
    %cst_27 = arith.constant dense<0.000000e+00> : vector<8x128xf32>
    %51 = tpu.matmul %48, %50, %cst_27 {dimension_numbers = #tpu.dot_dimension_numbers<[1], [0], [0], [1], [0, 0, 1, 1], [], []>} : vector<8x32xbf16>, vector<32x128xbf16>, vector<8x128xf32> -> vector<8x128xf32>
    %52 = arith.addf %46, %51 : vector<8x128xf32>
    %c0_28 = arith.constant 0 : index
    %53 = arith.index_cast %4 : i32 to index
    %c0_29 = arith.constant 0 : index
    %54 = vector.load %arg2[%c0_28, %53, %c0_29] : memref<1x8x128xf32, #tpu.memory_space<vmem>>, vector<1x8x128xf32>
    %55 = vector.shape_cast %54 : vector<1x8x128xf32> to vector<8x128xf32>
    %56 = arith.addf %55, %52 : vector<8x128xf32>
    %c0_30 = arith.constant 0 : index
    %c0_31 = arith.constant 0 : index
    %c0_32 = arith.constant 0 : index
    %57 = vector.load %arg8[%c0_30, %c0_31, %c0_32] : memref<1x8x128xf32, #tpu.memory_space<vmem>>, vector<1x8x128xf32>
    %58 = vector.shape_cast %57 : vector<1x8x128xf32> to vector<8x128xf32>
    %59 = vector.shape_cast %56 : vector<8x128xf32> to vector<1x8x128xf32>
    tpu.vector_store %arg8[%c0_30, %c0_31, %c0_32], %59 {strides = array<i32>} : memref<1x8x128xf32, #tpu.memory_space<vmem>>, vector<1x8x128xf32>,
    return
  }
  func.func @transform_0(%arg0: i32, %arg1: i32) -> (i32, i32, i32) {
    %c0_i32 = arith.constant 0 : i32
    %c0_i32_0 = arith.constant 0 : i32
    %c0_i32_1 = arith.constant 0 : i32
    return %arg0, %c0_i32, %c0_i32_0 : i32, i32, i32
  }
  func.func @transform_1(%arg0: i32, %arg1: i32) -> (i32, i32, i32, i32) {
    %c0_i32 = arith.constant 0 : i32
    %c0_i32_0 = arith.constant 0 : i32
    %c0_i32_1 = arith.constant 0 : i32
    %c0_i32_2 = arith.constant 0 : i32
    %c0_i32_3 = arith.constant 0 : i32
    return %c0_i32, %c0_i32_0, %c0_i32_1, %c0_i32_2 : i32, i32, i32, i32
  }
  func.func @transform_2(%arg0: i32, %arg1: i32) -> (i32, i32) {
    %c0_i32 = arith.constant 0 : i32
    %c0_i32_0 = arith.constant 0 : i32
    %c0_i32_1 = arith.constant 0 : i32
    return %c0_i32, %c0_i32_0 : i32, i32
  }
  func.func @transform_3(%arg0: i32, %arg1: i32) -> (i32, i32) {
    %c0_i32 = arith.constant 0 : i32
    %c0_i32_0 = arith.constant 0 : i32
    %c0_i32_1 = arith.constant 0 : i32
    return %c0_i32, %c0_i32_0 : i32, i32
  }
  func.func @transform_4(%arg0: i32, %arg1: i32) -> (i32, i32) {
    %c0_i32 = arith.constant 0 : i32
    %c0_i32_0 = arith.constant 0 : i32
    %c0_i32_1 = arith.constant 0 : i32
    return %c0_i32, %c0_i32_0 : i32, i32
  }
  func.func @transform_5(%arg0: i32, %arg1: i32) -> (i32, i32, i32) {
    %c0_i32 = arith.constant 0 : i32
    %c0_i32_0 = arith.constant 0 : i32
    %c0_i32_1 = arith.constant 0 : i32
    %c0_i32_2 = arith.constant 0 : i32
    return %c0_i32, %c0_i32_0, %c0_i32_1 : i32, i32, i32
  }
  func.func @transform_6(%arg0: i32, %arg1: i32) -> (i32, i32, i32) {
    %c0_i32 = arith.constant 0 : i32
    %c0_i32_0 = arith.constant 0 : i32
    return %arg0, %arg1, %c0_i32 : i32, i32, i32
  }
}

</mosaic_0001>

<bundles_post_ra>
// kernel: tpu_custom_call.1
= control target key start
LH: loop header
LB: loop body
LE: loop exit
PB: predicated region body
PF: predicated region fallthrough
CT: control target
= control target key end

     0   :  { %11 = vsyncpa [#allocation6], 0  ;;  %s2463_s0 = inlined_call_operand.hbm [shape: f32[2,8,128], index: 0, kind: input, shape index: {}]   ;;  %s2464_s1 = inlined_call_operand.hbm [shape: bf16[1,4,8,8], index: 1, kind: input, shape index: {}]   ;;  %s2465_s2 = inlined_call_operand.vmem [shape: f32[1,128], index: 2, kind: input, shape index: {}]   ;;  %s2466_s3 = inlined_call_operand.hbm [shape: bf16[128,128], index: 3, kind: input, shape index: {}]   ;;  %s2467_s4 = inlined_call_operand.hbm [shape: bf16[256,128], index: 4, kind: input, shape index: {}]   ;;  %s2468_s5 = inlined_call_operand.hbm [shape: bf16[4,32,128], index: 5, kind: input, shape index: {}]   ;;  %s2469_s6 = inlined_call_operand.hbm [shape: f32[2,8,128], index: 6, kind: output, shape index: {}]  }
   0x1   :  { %13 = vsyncpa [#allocation6 + $0x1], 0 }
   0x2   :  { %14 = vsyncpa [#allocation9], 0 }
   0x3   :  { %15 = vsyncpa [#allocation12], 0 }
   0x4   :  { %16 = vsyncpa [#allocation7], 0 }
   0x5   :  { %18 = vsyncpa [#allocation7 + $0x1], 0  ;;  %s2203_s21 = smov 0   ;;  %s2205_s22 = smov 0  }
   0x6   :  { %s2207_s23 = smov 0   ;;  %s2209_s24 = smov 0  }
   0x7   :  { %s2211_s25 = smov 0   ;;  %s2213_s26 = smov 0  }
   0x8 LB: > { %s1497_s27 = sadd.s32 4294967295, %s2154_s26   ;;  %p1499_p0 = scmp.ge.s32.totalorder %s2154_s26, 1  ;;  %s2154_s26 = sphi %s2213_s26, %s24_s26   ;;  %s2150_s25 = sphi %s2211_s25, %s2480_s25   ;;  %s2146_s24 = sphi %s2209_s24, %s2479_s24   ;;  %s2142_s23 = sphi %s2207_s23, %s2478_s23   ;;  %s2138_s22 = sphi %s2205_s22, %s2477_s22   ;;  %s2134_s21 = sphi %s2203_s21, %s2476_s21  }
   0x9   : > { %p2237_p1 = scmp.eq.s32.totalorder %s1497_s27, 0  ;;  %p200_p2 = scmp.lt.s32.totalorder %s2154_s26, 3 }
   0xa   : > { %s211_s7 = sshll.u32 %s2464_s1, 4  ;;  %s2156_s9 = smov [#allocation8]   ;;  %s212_s7 = int_to_ptr.hbm [resolvable:$true] %s211_s7 }
   0xb   : > { %p2245_p3 = pnand %p1499_p0, %p200_p2  ;;  %s213_s10 = sshll.u32 %s2156_s9, 4  ;;  %s214_s10 = int_to_ptr.vmem [resolvable:$true] %s213_s10 }
   0xc   : > { %p1504_p6 = scmp.ge.s32.totalorder %s2154_s26, 2  ;;  %s242_s14 = sshll.u32 %s2467_s4, 4  ;;  %s243_s14 = int_to_ptr.hbm [resolvable:$true] %s242_s14 }
   0xd   : > { %p1802_p4 = pneg %p2245_p3  ;;  %s2157_s15 = smov 64  }
   0xe   : > { %s2158_s16 = smov 4   ;;  %s2159_s17 = smov [#allocation11]  }
   0xf   : > { %p2253_p5 = pnand %p1802_p4, %p2237_p1  ;;  %s244_s18 = sshll.u32 %s2159_s17, 4  ;;  %s245_s18 = int_to_ptr.vmem [resolvable:$true] %s244_s18 }
  0x10   : > { %s228_s29 = sshll.u32 %s2466_s3, 4  ;;  %s2161_s13 = smov [#allocation13]   ;;  %s229_s29 = int_to_ptr.hbm [resolvable:$true] %s228_s29 }
  0x11   : > { %1805 = dma.hbm_to_vmem [thread:$0]  (!%p2253_p5), %s212_s7, 256, %s214_s10, [#allocation9], %s2157_s15, %s2157_s15, %s2158_s16  }
  0x12   : > { %1811 = dma.hbm_to_vmem [thread:$0]  (!%p2253_p5), %s243_s14, 2048, %s245_s18, [#allocation12], %s2157_s15, %s2157_s15, %s2158_s16  }
  0x13   : > { %s256_s7 = sshll.u32 %s2468_s5, 4  ;;  %s2160_s10 = smov [#allocation10]   ;;  %s257_s7 = int_to_ptr.hbm [resolvable:$true] %s256_s7 }
  0x14   : > { %s230_s12 = sshll.u32 %s2160_s10, 4  ;;  %s258_s17 = sshll.u32 %s2161_s13, 4  ;;  %s231_s12 = int_to_ptr.vmem [resolvable:$true] %s230_s12  ;;  %s259_s17 = int_to_ptr.vmem [resolvable:$true] %s258_s17 }
  0x15   : > { %1808 = dma.hbm_to_vmem [thread:$0]  (!%p2253_p5), %s229_s29, 1024, %s231_s12, [#allocation9], %s2157_s15, %s2157_s15, %s2158_s16  }
  0x16   : > { %1814 = dma.hbm_to_vmem [thread:$0]  (!%p2253_p5), %s257_s7, 1024, %s259_s17, [#allocation12], %s2157_s15, %s2157_s15, %s2158_s16  }
  0x17   : > { %s36_s14 = sadd.s32 1, %s2150_s25  ;;  %s1498_s18 = sadd.s32 4294967294, %s2154_s26  }
  0x18   : > { %p38_p7 = scmp.ge.s32.totalorder %s36_s14, 2  ;;  %s43_s19 = sadd.s32 1, %s2142_s23 }
  0x19   : > { %p50_p8 = scmp.ne.s32.totalorder %s2142_s23, %s2138_s22  ;;  %p51_p9 = scmp.eq.s32.totalorder %s2154_s26, 0 }
  0x1a   : > { %s2482_s14 = smov (%p38_p7, %s36_s14), 0  ;;  %p56_p10 = scmp.ne.s32.totalorder %s2138_s22, %s2134_s21 }
  0x1b   : > { %s40_s20 = ssub.s32 %s2150_s25, %s2482_s14  ;;  %p187_p11 = scmp.eq.s32.totalorder %s1497_s27, 1 }
  0x1c   : > { %p41_p12 = scmp.eq.s32.totalorder %s40_s20, 0  ;;  %p2291_p13 = por %p2237_p1, %p56_p10 }
  0x1d   : > { %p2295_p0 = por %p187_p11, %p50_p8  ;;  %p193_p2 = scmp.eq.s32.totalorder %s1498_s18, 1 }
  0x1e   : > { %s2300_s16 = scalar_select %p41_p12, %s2142_s23, %s43_s19  }
  0x1f   : > { %p52_p4 = por %p51_p9, %p50_p8  ;;  %p2302_p5 = por %p193_p2, %p56_p10 }
  0x20   : > { %s272_s30 = sand.u32 1, %s2142_s23   ;;  %s1506_s27 = sshll.u32 %s2150_s25, 3 }
  0x21   : > { %p1827_p7 = scmp.lt.s32.totalorder %s2154_s26, 2  ;;  %s1505_s9 = sshll.u32 %s272_s30, 3 }
  0x22   : > { %s280_s12 = scalar_lea.hbm %s2463_s0, %s1506_s27  ;;  %s276_s17 = scalar_lea.vmem [#allocation5], %s1505_s9 }
  0x23   : > { %s282_s13 = sshll.u32 %s280_s12, 4  ;;  %s284_s20 = sshll.u32 %s276_s17, 4  ;;  %s283_s13 = int_to_ptr.hbm [resolvable:$true] %s282_s13  ;;  %s285_s20 = int_to_ptr.vmem [resolvable:$true] %s284_s20 }
  0x24   : > { %p1816_p11 = pnand %p1827_p7, %p52_p4  ;;  %s273_s18 = scalar_lea.sflag [#allocation6], %s272_s30 }
  0x25   : > { %293 = sbr.rel (%p2245_p3) target bundleno = 1173 (0x495), region = 44  ;;  %s2315_s19 = sand.u32 (!%p2245_p3), 1, %s2138_s22  }
  0x26   : > { %1818 = dma.hbm_to_vmem [thread:$0]  (!%p1816_p11), %s283_s13, 128, %s285_s20, %s273_s18  }
  0x27   : > { %s1508_s7 = sshll.u32 (!%p2245_p3), %s2315_s19, 3  ;;  %s296_s27 = scalar_lea.sflag (!%p2245_p3), [#allocation6], %s2315_s19 }
  0x28   : > { %s2321_s9 = scalar_lea.vmem (!%p2245_p3), [#allocation5], %s1508_s7 }
  0x2a   : > { %2117 = dma.done.wait (%p2291_p13), %s296_s27, 128  }
  0x2b   : > { %2119 = vsyncadd (%p2291_p13), %s296_s27, 4294967168 }
  0x2c   : > { %2121 = dma.done.wait (%p2237_p1), [#allocation9], 1280  }
  0x2d   : > { %2123 = vsyncadd (%p2237_p1), [#allocation9], 4294966016 }
  0x2e   : > { %2125 = dma.done.wait (%p2237_p1), [#allocation12], 3072  }
  0x2f   : > { %2127 = vsyncadd (%p2237_p1), [#allocation12], 4294964224  ;;  %v354_v0 = vld [vmem:[%s2321_s9] sm:$0xff]  ;;  %v1729_v1 = vld [vmem:[#allocation10 + $0x38] sm:$0xff]  ;;  %v2162_v5 = vmov 128.0   ;;  %s2163_s11 = smov 64  }
  0x30   : > { %v355_v2 = vmul.f32 %v354_v0, %v354_v0  ;;  %448 = vmatpush.bf16.msra.mxu0 %v1729_v1  ;;  %v1728_v3 = vld [vmem:[#allocation10 + $0x30] sm:$0xff]  ;;  %v1727_v4 = vld [vmem:[#allocation10 + $0x28] sm:$0xff]  ;;  %1894 = vrcp.f32 %v2162_v5  ;;  %v1726_v6 = vld [vmem:[#allocation10 + $0x20] sm:$0xff]  ;;  %s2164_s30 = smov 96   ;;  %s2165_s10 = smov 32   ;;  %vm842_vm4 = vcmask 60416  }
  0x31   : > { %v1725_v8 = vld [vmem:[#allocation10 + $0x18] sm:$0xff]  ;;  %v1724_v10 = vld [vmem:[#allocation10 + $0x10] sm:$0xff]  ;;  %v1723_v12 = vld [vmem:[#allocation10 + $0x8] sm:$0xff]  ;;  %vm492_vm5 = vcmask 1047556   ;;  %vm588_vm6 = vcmask 257024   ;;  %vm922_vm7 = vcmask 261120  }
  0x32   : > { %356 = vadd.xlane.f32.xlu0 %v355_v2  ;;  %v1722_v14 = vld [vmem:[#allocation10] sm:$0xff]  ;;  %v1893_v26 = vld [vmem:[%s2465_s2] ss:$0 sm:$0xff]  ;;  %v1731_v32 = vld [vmem:[#allocation11 + $0x8] sm:$0xff]  ;;  %vm1023_vm8 = vcmask 64512   ;;  %s1719_s12 = sshll.u32 %s2146_s24, 3 }
  0x33   : > { %v1730_v31 = vld [vmem:[#allocation11] sm:$0xff]  ;;  %v1732_v34 = vld [vmem:[#allocation11 + $0x10] sm:$0xff]  ;;  %v1735_v35 = vld [vmem:[#allocation11 + $0x28] sm:$0xff]  ;;  %s1369_s20 = scalar_lea.hbm %s2469_s6, %s1719_s12  ;;  %s348_s18 = scalar_lea.vmem [#allocation14], %s1508_s7 }
  0x34   : > { %449 = vmatpush.bf16.msra.mxu0 %v1728_v3  ;;  %v1734_v33 = vld [vmem:[#allocation11 + $0x20] sm:$0xff]  ;;  %v1733_v36 = vld [vmem:[#allocation11 + $0x18] sm:$0xff]  ;;  %v1736_v37 = vld [vmem:[#allocation11 + $0x30] sm:$0xff]  ;;  %s1371_s27 = sshll.u32 %s348_s18, 4  ;;  %s1373_s28 = sshll.u32 %s1369_s20, 4  ;;  %s1372_s27 = int_to_ptr.vmem [resolvable:$true] %s1371_s27  ;;  %s1374_s28 = int_to_ptr.hbm [resolvable:$true] %s1373_s28 }
  0x35   : > { %v1737_v38 = vld [vmem:[#allocation11 + $0x38] sm:$0xff]  ;;  %v1738_v60 = vld [vmem:[#allocation11 + $0x40] sm:$0xff]  ;;  %v1743_v62 = vld [vmem:[#allocation11 + $0x68] sm:$0xff]  ;;  %s1358_s8 = scalar_lea.sflag [#allocation7], %s2315_s19  ;;  %s2078_s24 = sshra.s32 %s1374_s28, 4  ;;  %s2079_s24 = int_to_ptr.hbm [resolvable:$true] %s2078_s24 }
  0x36   : > { %v1895_v7 = vpop.eup %1894  ;;  %v1742_v63 = vld [vmem:[#allocation11 + $0x60] sm:$0xff]  ;;  %v1739_v5 = vld [vmem:[#allocation11 + $0x48] sm:$0xff]  ;;  %p2085_p9 = scmp.lt.s32.totalorder %s2079_s24, %s2469_s6 }
  0x37   : > { %v359_v9 = vmul.f32 128.0, %v1895_v7  ;;  %vm363_vm0 = vweird.f32 %v1895_v7 }
  0x38   : > { %450 = vmatpush.bf16.msra.mxu0 %v1727_v4 }
  0x39   : > { %v360_v11 = vsub.f32 1.0, %v359_v9 }
  0x3b   : > { %v361_v13 = vmul.f32 %v1895_v7, %v360_v11 }
  0x3c   : > { %451 = vmatpush.bf16.msra.mxu0 %v1726_v6 }
  0x3d   : > { %v362_v15 = vadd.f32 %v1895_v7, %v361_v13 }
  0x3f   : > { %v364_v16 = vsel %vm363_vm0, %v1895_v7, %v362_v15 }
  0x40   : > { %452 = vmatpush.bf16.msra.mxu0 %v1725_v8 }
  0x44   : > { %453 = vmatpush.bf16.msra.mxu0 %v1724_v10 }
  0x48   : > { %454 = vmatpush.bf16.msra.mxu0 %v1723_v12 }
  0x4c   : > { %455 = vmatpush.bf16.msra.mxu0 %v1722_v14 }
  0xa5   : > { %v357_v17 = vpop.xlane.xlu0 %356 }
  0xa6   : > { %v365_v18 = vmul.f32 %v364_v16, %v357_v17  ;;  %v1744_v17 = vld [vmem:[#allocation11 + $0x70] sm:$0xff] }
  0xa8   : > { %v366_v19 = vadd.f32 1e-06, %v365_v18 }
  0xaa   : > { %1896 = vrsqrt.f32 %v366_v19  ;;  %vm373_vm2 = vweird.f32 %v366_v19 }
  0xb0   : > { %v1897_v20 = vpop.eup %1896 }
  0xb1   : > { %v368_v21 = vmul.f32 %v1897_v20, %v366_v19  ;;  %vm374_vm1 = vweird.f32 %v1897_v20  ;;  %v1745_v19 = vld [vmem:[#allocation11 + $0x78] sm:$0xff] }
  0xb2   : > { %vm375_vm3 = vmor %vm373_vm2, %vm374_vm1 }
  0xb3   : > { %v369_v22 = vmul.f32 %v1897_v20, %v368_v21 }
  0xb5   : > { %v370_v23 = vmul.f32 0.5, %v369_v22  ;;  %v2166_v22 = vmov 1983009808  }
  0xb7   : > { %v371_v24 = vsub.f32 1.5, %v370_v23  ;;  %v483_v23 = vunpack.c.l.s4 %v2166_v22 }
  0xb9   : > { %v372_v25 = vmul.f32 %v1897_v20, %v371_v24 }
  0xbb   : > { %v376_v27 = vsel %vm375_vm3, %v1897_v20, %v372_v25 }
  0xbc   : > { %v377_v28 = vmul.f32 %v376_v27, %v354_v0  ;;  %v484_v27 = vunpack.c.0.s8 %v483_v23 }
  0xbe   : > { %v382_v29 = vmul.f32 %v1893_v26, %v377_v28 }
  0xc0   : > { %v383_v30 = vpack.c.bf16 %v382_v29, %v382_v29 }
  0xc2   : > { %456 = vmatmul.bf16.vlgmr.msra.gmra.mxu0 %v383_v30  ;;  %1779 = vmatpush.bf16.xpose.msra.mxu1 %v383_v30 }
  0xc3   : > { %728 = vmatpush.bf16.xpose.msrb.mxu0 %v383_v30  ;;  %1780 = vmatpush.bf16.xpose.msra.mxu2 %v383_v30 }
  0xc4   : > { %1781 = vmatpush.bf16.xpose.msra.mxu3 %v383_v30 }
  0xc9   : > { %749 = vmatmul.bf16.vlgmr.msra.gmra.mxu1 %v1734_v33 }
  0xca   : > { %789 = vmatmul.bf16.vlgmr.msra.gmra.mxu2 %v1742_v63 }
  0xcb   : > { %794 = vmatmul.bf16.vlgmr.msra.gmra.mxu3 %v1743_v62 }
  0xd2   : > { %729 = vmatmul.bf16.vlgmr.msrb.gmra.mxu0 %v1730_v31  ;;  %v2167_v31 = vmov 1934713408  }
  0xd9   : > { %754 = vmatmul.bf16.gmra.mxu1 %v1735_v35 }
  0xdb   : > { %799 = vmatmul.bf16.gmra.mxu3 %v1744_v17 }
  0xe2   : > { %734 = vmatmul.bf16.gmra.mxu0 %v1731_v32  ;;  %v497_v32 = vunpack.c.l.s4 %v2167_v31 }
  0xe9   : > { %759 = vmatmul.bf16.gmra.mxu1 %v1736_v37 }
  0xeb   : > { %804 = vmatmul.bf16.gmra.mxu3 %v1745_v19 }
  0xf2   : > { %739 = vmatmul.bf16.gmra.mxu0 %v1732_v34 }
  0xf9   : > { %764 = vmatmul.bf16.gmra.mxu1 %v1737_v38 }
 0x102   : > { %744 = vmatmul.bf16.gmra.mxu0 %v1733_v36 }
 0x109   : > { %769 = vmatmul.bf16.gmra.mxu1 %v1738_v60 }
 0x119   : > { %774 = vmatmul.bf16.gmra.mxu1 %v1739_v5 }
 0x13f   : > { %v457_v39 = vpop.f32.mrf.mxu0 }
 0x140   : > { %v2339_v40 = vpack.c.bf16 %v457_v39, %v457_v39 }
 0x142   : > { %465 = vrot.lane.b32.xlu1 %v2339_v40, %s2163_s11  ;;  %463 = vrot.lane.b32.xlu0 %v2339_v40, %s2164_s30  ;;  %v472_v29 = vshrl.u32 %v2339_v40, 16  ;;  %s2080_s11 = scalar_lea.hbm %s2079_s24, 8 }
 0x143   : > { %p2081_p1 = scmp.ne.s32.totalorder %s2079_s24, %s2080_s11 }
 0x145   : > { %p2082_p3 = pnand %p2081_p1, %p2295_p0 }
 0x146   : > { %v750_v48 = vpop.f32.mrf.mxu1 }
 0x147   : > { %v459_v41 = vpop.f32.mrf.mxu0  ;;  %v818_v49 = vpack.c.bf16 %v750_v48, %v750_v48  ;;  %p2083_p8 = pneg %p2082_p3 }
 0x149   : > { %851 = vst.msk [vmem:[#allocation3 + $0x20] sm:$0xf] %vm842_vm4, %v818_v49 }
 0x14a   : > { %467 = vrot.lane.b32.xlu1 %v2339_v40, %s2165_s10 }
 0x14e   : > { %v752_v52 = vpop.f32.mrf.mxu1 }
 0x14f   : > { %v730_v42 = vpop.f32.mrf.mxu0  ;;  %v819_v53 = vpack.c.bf16 %v752_v52, %v752_v52 }
 0x150   : > { %v810_v43 = vpack.c.bf16 %v730_v42, %v730_v42  ;;  %v498_v42 = vunpack.c.0.s8 %v497_v32 }
 0x151   : > { %852 = vst.msk [vmem:[#allocation3 + $0x24] sm:$0xf] %vm842_vm4, %v819_v53 }
 0x152   : > { %843 = vst.msk [vmem:[#allocation3] sm:$0xf] %vm842_vm4, %v810_v43 }
 0x156   : > { %v755_v57 = vpop.f32.mrf.mxu1 }
 0x157   : > { %v732_v44 = vpop.f32.mrf.mxu0  ;;  %v820_v59 = vpack.c.bf16 %v755_v57, %v755_v57 }
 0x158   : > { %v811_v45 = vpack.c.bf16 %v732_v44, %v732_v44  ;;  %v1750_v15 = vld [vmem:[#allocation3 + $0x20] sm:$0xff] }
 0x159   : > { %853 = vst.msk [vmem:[#allocation3 + $0x28] sm:$0xf] %vm842_vm4, %v820_v59 }
 0x15a   : > { %844 = vst.msk [vmem:[#allocation3 + $0x4] sm:$0xf] %vm842_vm4, %v811_v45 }
 0x15e   : > { %v757_v1 = vpop.f32.mrf.mxu1 }
 0x15f   : > { %v735_v46 = vpop.f32.mrf.mxu0  ;;  %v821_v2 = vpack.c.bf16 %v757_v1, %v757_v1 }
 0x160   : > { %v812_v47 = vpack.c.bf16 %v735_v46, %v735_v46 }
 0x161   : > { %v1746_v58 = vld [vmem:[#allocation3] sm:$0xff]  ;;  %854 = vst.msk [vmem:[#allocation3 + $0x2c] sm:$0xf] %vm842_vm4, %v821_v2 }
 0x162   : > { %845 = vst.msk [vmem:[#allocation3 + $0x8] sm:$0xf] %vm842_vm4, %v812_v47 }
 0x166   : > { %v760_v6 = vpop.f32.mrf.mxu1 }
 0x167   : > { %v737_v50 = vpop.f32.mrf.mxu0  ;;  %v822_v7 = vpack.c.bf16 %v760_v6, %v760_v6 }
 0x168   : > { %v813_v51 = vpack.c.bf16 %v737_v50, %v737_v50  ;;  %v1751_v8 = vld [vmem:[#allocation3 + $0x28] sm:$0xff] }
 0x169   : > { %855 = vst.msk [vmem:[#allocation3 + $0x30] sm:$0xf] %vm842_vm4, %v822_v7 }
 0x16a   : > { %846 = vst.msk [vmem:[#allocation3 + $0xc] sm:$0xf] %vm842_vm4, %v813_v51 }
 0x16e   : > { %v762_v11 = vpop.f32.mrf.mxu1 }
 0x16f   : > { %v740_v54 = vpop.f32.mrf.mxu0  ;;  %v823_v12 = vpack.c.bf16 %v762_v11, %v762_v11 }
 0x170   : > { %v814_v55 = vpack.c.bf16 %v740_v54, %v740_v54 }
 0x171   : > { %v1747_v56 = vld [vmem:[#allocation3 + $0x8] sm:$0xff]  ;;  %856 = vst.msk [vmem:[#allocation3 + $0x34] sm:$0xf] %vm842_vm4, %v823_v12 }
 0x172   : > { %847 = vst.msk [vmem:[#allocation3 + $0x10] sm:$0xf] %vm842_vm4, %v814_v55  ;;  %932 = vmatpush.bf16.msrb.mxu2 %v1747_v56 }
 0x176   : > { %933 = vmatpush.bf16.msrb.mxu2 %v1746_v58  ;;  %v765_v16 = vpop.f32.mrf.mxu1 }
 0x177   : > { %v742_v61 = vpop.f32.mrf.mxu0  ;;  %v824_v18 = vpack.c.bf16 %v765_v16, %v765_v16 }
 0x178   : > { %v815_v0 = vpack.c.bf16 %v742_v61, %v742_v61  ;;  %v1752_v36 = vld [vmem:[#allocation3 + $0x30] sm:$0xff] }
 0x179   : > { %857 = vst.msk [vmem:[#allocation3 + $0x38] sm:$0xf] %vm842_vm4, %v824_v18 }
 0x17a   : > { %848 = vst.msk [vmem:[#allocation3 + $0x14] sm:$0xf] %vm842_vm4, %v815_v0  ;;  %988 = vmatpush.bf16.msra.mxu2 %v1751_v8 }
 0x17e   : > { %989 = vmatpush.bf16.msra.mxu2 %v1750_v15  ;;  %v767_v20 = vpop.f32.mrf.mxu1 }
 0x17f   : > { %v745_v3 = vpop.f32.mrf.mxu0  ;;  %v825_v21 = vpack.c.bf16 %v767_v20, %v767_v20 }
 0x180   : > { %v816_v4 = vpack.c.bf16 %v745_v3, %v745_v3 }
 0x181   : > { %v1748_v14 = vld [vmem:[#allocation3 + $0x10] sm:$0xff]  ;;  %858 = vst.msk [vmem:[#allocation3 + $0x3c] sm:$0xf] %vm842_vm4, %v825_v21 }
 0x182   : > { %849 = vst.msk [vmem:[#allocation3 + $0x18] sm:$0xf] %vm842_vm4, %v816_v4 }
 0x187   : > { %v747_v9 = vpop.f32.mrf.mxu0 }
 0x188   : > { %v817_v10 = vpack.c.bf16 %v747_v9, %v747_v9  ;;  %v1753_v33 = vld [vmem:[#allocation3 + $0x38] sm:$0xff] }
 0x18a   : > { %850 = vst.msk [vmem:[#allocation3 + $0x1c] sm:$0xf] %vm842_vm4, %v817_v10 }
 0x191   : > { %v1749_v13 = vld [vmem:[#allocation3 + $0x18] sm:$0xff] }
 0x192   : > { %960 = vmatpush.bf16.msrb.mxu3 %v1749_v13 }
 0x196   : > { %961 = vmatpush.bf16.msrb.mxu3 %v1748_v14 }
 0x19a   : > { %1016 = vmatpush.bf16.msra.mxu3 %v1753_v33  ;;  %v770_v33 = vpop.f32.mrf.mxu1 }
 0x19e   : > { %1017 = vmatpush.bf16.msra.mxu3 %v1752_v36 }
 0x1b4   : > { %v466_v24 = vpop.permute.xlu1 %465  ;;  %v464_v25 = vpop.permute.xlu0 %463 }
 0x1b5   : > { %v473_v26 = vshrl.u32 %v464_v25, 16  ;;  %v471_v28 = vpack.i.b16 %v464_v25, %v2339_v40  ;;  %v478_v37 = vshrl.u32 %v466_v24, 16 }
 0x1b7   : > { %v474_v30 = vpack.i.b16 %v473_v26, %v472_v29  ;;  %v485_v34 = vperm.slane %v471_v28, %v484_v27 }
 0x1b9   : > { %v512_v38 = vperm.slane %v474_v30, %v484_v27  ;;  %v494_v43 = vrot.slane %v485_v34, 4 }
 0x1bb   : > { %v520_v46 = vrot.slane %v512_v38, 4 }
 0x1bc   : > { %v468_v35 = vpop.permute.xlu1 %467 }
 0x1bd   : > { %v477_v39 = vpack.i.b16 %v468_v35, %v466_v24  ;;  %v479_v41 = vshrl.u32 %v468_v35, 16  ;;  %v772_v35 = vpop.f32.mrf.mxu1 }
 0x1be   : > { %v827_v36 = vpack.c.bf16 %v772_v35, %v772_v35 }
 0x1bf   : > { %v480_v44 = vpack.i.b16 %v479_v41, %v478_v37  ;;  %v490_v45 = vperm.slane %v477_v39, %v484_v27  ;;  %v795_v37 = vpop.f32.mrf.mxu3 }
 0x1c0   : > { %860 = vst.msk [vmem:[#allocation4 + $0x4] sm:$0xf] %vm842_vm4, %v827_v36 }
 0x1c1   : > { %v491_v40 = vrot.slane %v490_v45, 4  ;;  %v495_v47 = vsel %vm492_vm5, %v490_v45, %v494_v43  ;;  %v517_v48 = vperm.slane %v480_v44, %v484_v27  ;;  %v790_v44 = vpop.f32.mrf.mxu2 }
 0x1c2   : > { %v503_v49 = vperm.slane %v495_v47, %v498_v42  ;;  %v834_v45 = vpack.c.bf16 %v790_v44, %v790_v44 }
 0x1c3   : > { %v493_v50 = vsel %vm492_vm5, %v491_v40, %v485_v34  ;;  %v518_v51 = vrot.slane %v517_v48, 4  ;;  %v521_v52 = vsel %vm492_vm5, %v517_v48, %v520_v46  ;;  %v826_v34 = vpack.c.bf16 %v770_v33, %v770_v33 }
 0x1c4   : > { %v499_v53 = vperm.slane %v493_v50, %v498_v42  ;;  %v506_v54 = vrot.slane %v503_v49, 4  ;;  %v529_v55 = vperm.slane %v521_v52, %v498_v42  ;;  %867 = vst.msk [vmem:[#allocation4 + $0x20] sm:$0xf] %vm842_vm4, %v834_v45 }
 0x1c5   : > { %v519_v56 = vsel %vm492_vm5, %v518_v51, %v512_v38  ;;  %859 = vst.msk [vmem:[#allocation4] sm:$0xf] %vm842_vm4, %v826_v34  ;;  %v836_v38 = vpack.c.bf16 %v795_v37, %v795_v37  ;;  %v775_v39 = vpop.f32.mrf.mxu1 }
 0x1c6   : > { %v504_v57 = vrot.slane %v499_v53, 4  ;;  %v507_v58 = vsel %vm492_vm5, 0, %v506_v54  ;;  %v525_v59 = vperm.slane %v519_v56, %v498_v42  ;;  %v532_v60 = vrot.slane %v529_v55, 4 }
 0x1c7   : > { %v539_v61 = vrot.slane %v507_v58, 4  ;;  %v534_v1 = vsel %vm492_vm5, %v506_v54, %v499_v53  ;;  %869 = vst.msk [vmem:[#allocation4 + $0x28] sm:$0xf] %vm842_vm4, %v836_v38  ;;  %v828_v41 = vpack.c.bf16 %v775_v39, %v775_v39 }
 0x1c8   : > { %v505_v62 = vsel %vm492_vm5, 0, %v504_v57  ;;  %v530_v63 = vrot.slane %v525_v59, 4  ;;  %v533_v0 = vsel %vm492_vm5, 0, %v532_v60  ;;  %v553_v6 = vsel %vm492_vm5, %v532_v60, %v525_v59 }
 0x1c9   : > { %v540_v2 = vsel %vm492_vm5, %v539_v61, %v505_v62  ;;  %v558_v3 = vrot.slane %v533_v0, 4  ;;  %v538_v8 = vperm.slane %v534_v1, %v484_v27  ;;  %v557_v12 = vperm.slane %v553_v6, %v484_v27  ;;  %861 = vst.msk [vmem:[#allocation4 + $0x8] sm:$0xf] %vm842_vm4, %v828_v41  ;;  %v792_v47 = vpop.f32.mrf.mxu2  ;;  %v1771_v1 = vld [vmem:[#allocation8] sm:$0xff]  }
 0x1ca   : > { %v531_v4 = vsel %vm492_vm5, 0, %v530_v63  ;;  %v544_v5 = vperm.slane %v540_v2, %v484_v27  ;;  %v835_v48 = vpack.c.bf16 %v792_v47, %v792_v47  ;;  %v1740_v2 = vld [vmem:[#allocation11 + $0x50] sm:$0xff] }
 0x1cb   : > { %v559_v7 = vsel %vm492_vm5, %v558_v3, %v531_v4  ;;  %779 = vmatmul.bf16.gmra.mxu1 %v1740_v2  ;;  %v1772_v3 = vunpack.c.l.bf16 %v1771_v1 }
 0x1cc   : > { %v545_v9 = vrot.slane %v544_v5, 4  ;;  %v563_v10 = vperm.slane %v559_v7, %v484_v27  ;;  %868 = vst.msk [vmem:[#allocation4 + $0x24] sm:$0xf] %vm842_vm4, %v835_v48  ;;  %v1754_v51 = vld [vmem:[#allocation4] sm:$0xff]  ;;  %v1773_v7 = vunpack.c.h.bf16 %v1771_v1 }
 0x1cd   : > { %v777_v46 = vpop.f32.mrf.mxu1  ;;  %v1102_v53 = vsel %vm1023_vm8, %v1754_v51, 0 }
 0x1ce   : > { %v546_v11 = vsel %vm492_vm5, %v545_v9, %v538_v8  ;;  %v564_v13 = vrot.slane %v563_v10, 4  ;;  %v829_v40 = vpack.c.bf16 %v777_v46, %v777_v46 }
 0x1cf   : > { %v550_v14 = vperm.slane %v546_v11, %v498_v42  ;;  %v1741_v11 = vld [vmem:[#allocation11 + $0x58] sm:$0xff] }
 0x1d0   : > { %v565_v15 = vsel %vm492_vm5, %v564_v13, %v557_v12  ;;  %862 = vst.msk [vmem:[#allocation4 + $0xc] sm:$0xf] %vm842_vm4, %v829_v40  ;;  %v1778_v13 = vld [vmem:[#allocation8 + $0x8] sm:$0xff]  }
 0x1d1   : > { %v551_v16 = vrot.slane %v550_v14, 4  ;;  %v569_v17 = vperm.slane %v565_v15, %v498_v42  ;;  %v576_v18 = vshrl.u32 %v550_v14, 16  ;;  %v797_v42 = vpop.f32.mrf.mxu3  ;;  %v1776_v15 = vunpack.c.l.bf16 %v1778_v13 }
 0x1d2   : > { %v837_v43 = vpack.c.bf16 %v797_v42, %v797_v42 }
 0x1d3   : > { %v552_v19 = vsel %vm492_vm5, 0, %v551_v16  ;;  %v570_v20 = vrot.slane %v569_v17, 4  ;;  %v574_v21 = vpack.i.b16 %v569_v17, %v550_v14  ;;  %v577_v22 = vshrl.u32 %v569_v17, 16  ;;  %v1758_v55 = vld [vmem:[#allocation4 + $0x20] sm:$0xff] }
 0x1d4   : > { %v584_v26 = vshrl.u32 %v552_v19, 16  ;;  %870 = vst.msk [vmem:[#allocation4 + $0x2c] sm:$0xf] %vm842_vm4, %v837_v43  ;;  %v1166_v58 = vsel %vm1023_vm8, %v1758_v55, 0  ;;  %v1777_v16 = vunpack.c.h.bf16 %v1778_v13 }
 0x1d5   : > { %v571_v23 = vsel %vm492_vm5, 0, %v570_v20  ;;  %v578_v24 = vpack.i.b16 %v577_v22, %v576_v18  ;;  %589 = vst.msk [vmem:[#allocation2] sm:$0xf] %vm588_vm6, %v574_v21 }
 0x1d6   : > { %v582_v25 = vpack.i.b16 %v571_v23, %v552_v19  ;;  %v585_v27 = vshrl.u32 %v571_v23, 16 }
 0x1d7   : > { %590 = vst.msk [vmem:[#allocation2 + $0x4] sm:$0xf] %vm588_vm6, %v578_v24  ;;  %v1755_v49 = vld [vmem:[#allocation4 + $0x8] sm:$0xff] }
 0x1d8   : > { %v586_v28 = vpack.i.b16 %v585_v27, %v584_v26  ;;  %591 = vst.msk [vmem:[#allocation2 + $0x8] sm:$0xf] %vm588_vm6, %v582_v25  ;;  %v1105_v50 = vsel %vm1023_vm8, %v1755_v49, 0 }
 0x1d9   : > { %v800_v56 = vpop.f32.mrf.mxu3 }
 0x1da   : > { %592 = vst.msk [vmem:[#allocation2 + $0xc] sm:$0xf] %vm588_vm6, %v586_v28  ;;  %v838_v57 = vpack.c.bf16 %v800_v56, %v800_v56 }
 0x1db   : > { %v1759_v52 = vld [vmem:[#allocation4 + $0x28] sm:$0xff]  ;;  %784 = vmatmul.bf16.gmra.mxu1 %v1741_v11 }
 0x1dc   : > { %v880_v29 = vld [vmem:[#allocation2] sm:$0xf]  ;;  %v1169_v54 = vsel %vm1023_vm8, %v1759_v52, 0  ;;  %871 = vst.msk [vmem:[#allocation4 + $0x30] sm:$0xf] %vm842_vm4, %v838_v57 }
 0x1dd   : > { %1618 = vmatmul.msk.bf16.vlgmr.msrb.gmra.mxu2 %vm922_vm7, %v880_v29 }
 0x1de   : > { %v881_v30 = vld [vmem:[#allocation2 + $0x4] sm:$0xf]  ;;  %1113 = vmatpush.bf16.xpose.msrb.mxu2 %v1105_v50 }
 0x1df   : > { %1627 = vmatmul.msk.bf16.vlgmr.msrb.gmra.mxu3 %vm922_vm7, %v881_v30  ;;  %v882_v31 = vld [vmem:[#allocation2 + $0x8] sm:$0xf] }
 0x1e1   : > { %v883_v32 = vld [vmem:[#allocation2 + $0xc] sm:$0xf]  ;;  %v802_v59 = vpop.f32.mrf.mxu3 }
 0x1e2   : > { %v839_v60 = vpack.c.bf16 %v802_v59, %v802_v59 }
 0x1e4   : > { %872 = vst.msk [vmem:[#allocation4 + $0x34] sm:$0xf] %vm842_vm4, %v839_v60 }
 0x1e6   : > { %1114 = vmatpush.bf16.xpose.msrb.mxu2 %v1102_v53 }
 0x1e9   : > { %v805_v61 = vpop.f32.mrf.mxu3 }
 0x1ea   : > { %v840_v62 = vpack.c.bf16 %v805_v61, %v805_v61 }
 0x1ec   : > { %873 = vst.msk [vmem:[#allocation4 + $0x38] sm:$0xf] %vm842_vm4, %v840_v62 }
 0x1ed   : > { %1636 = vmatmul.msk.bf16.vlgmr.msra.gmra.mxu2 %vm922_vm7, %v882_v31 }
 0x1ee   : > { %1177 = vmatpush.bf16.xpose.msra.mxu2 %v1169_v54 }
 0x1ef   : > { %1645 = vmatmul.msk.bf16.vlgmr.msra.gmra.mxu3 %vm922_vm7, %v883_v32 }
 0x1f1   : > { %v807_v63 = vpop.f32.mrf.mxu3 }
 0x1f2   : > { %v841_v0 = vpack.c.bf16 %v807_v63, %v807_v63 }
 0x1f4   : > { %874 = vst.msk [vmem:[#allocation4 + $0x3c] sm:$0xf] %vm842_vm4, %v841_v0  ;;  %v1763_v0 = vld [vmem:[#allocation13 + $0x8] sm:$0xff] }
 0x1f5   : > { %1278 = vmatpush.bf16.msra.mxu0 %v1763_v0 }
 0x1f6   : > { %1178 = vmatpush.bf16.xpose.msra.mxu2 %v1166_v58 }
 0x1fb   : > { %v1761_v61 = vld [vmem:[#allocation4 + $0x38] sm:$0xff] }
 0x1fc   : > { %v1201_v63 = vsel %vm1023_vm8, %v1761_v61, 0 }
 0x248   : > { %v780_v28 = vpop.f32.mrf.mxu1 }
 0x249   : > { %v830_v29 = vpack.c.bf16 %v780_v28, %v780_v28 }
 0x24b   : > { %863 = vst.msk [vmem:[#allocation4 + $0x10] sm:$0xf] %vm842_vm4, %v830_v29 }
 0x250   : > { %v782_v35 = vpop.f32.mrf.mxu1 }
 0x251   : > { %v831_v36 = vpack.c.bf16 %v782_v35, %v782_v35 }
 0x253   : > { %864 = vst.msk [vmem:[#allocation4 + $0x14] sm:$0xf] %vm842_vm4, %v831_v36 }
 0x258   : > { %v785_v45 = vpop.f32.mrf.mxu1 }
 0x259   : > { %v832_v46 = vpack.c.bf16 %v785_v45, %v785_v45 }
 0x25a   : > { %v1756_v55 = vld [vmem:[#allocation4 + $0x10] sm:$0xff] }
 0x25b   : > { %865 = vst.msk [vmem:[#allocation4 + $0x18] sm:$0xf] %vm842_vm4, %v832_v46  ;;  %v1134_v56 = vsel %vm1023_vm8, %v1756_v55, 0 }
 0x260   : > { %v935_v4 = vpop.f32.mrf.mxu2  ;;  %v787_v49 = vpop.f32.mrf.mxu1 }
 0x261   : > { %v936_v5 = vadd.f32 %v1772_v3, %v935_v4  ;;  %v833_v50 = vpack.c.bf16 %v787_v49, %v787_v49  ;;  %v1760_v4 = vld [vmem:[#allocation4 + $0x30] sm:$0xff] }
 0x262   : > { %v963_v6 = vpop.f32.mrf.mxu3 }
 0x263   : > { %v1024_v8 = vsel %vm1023_vm8, %v936_v5, -inf  ;;  %v964_v9 = vadd.f32 %v1773_v7, %v963_v6  ;;  %866 = vst.msk [vmem:[#allocation4 + $0x1c] sm:$0xf] %vm842_vm4, %v833_v50  ;;  %v1198_v6 = vsel %vm1023_vm8, %v1760_v4, 0 }
 0x264   : > { %1025 = vmax.xlane.f32.xlu2 %v1024_v8 }
 0x265   : > { %v1027_v14 = vsel %vm1023_vm8, %v964_v9, -inf }
 0x268   : > { %v937_v10 = vpop.f32.mrf.mxu2 }
 0x26a   : > { %v965_v12 = vpop.f32.mrf.mxu3  ;;  %v1757_v53 = vld [vmem:[#allocation4 + $0x18] sm:$0xff] }
 0x26b   : > { %v1137_v54 = vsel %vm1023_vm8, %v1757_v53, 0 }
 0x26c   : > { %1028 = vmax.xlane.f32.xlu2 %v1027_v14  ;;  %1145 = vmatpush.bf16.xpose.msrb.mxu3 %v1137_v54  ;;  %v1762_v14 = vld [vmem:[#allocation13] sm:$0xff] }
 0x26d   : > { %1279 = vmatpush.bf16.msra.mxu0 %v1762_v14 }
 0x270   : > { %v991_v17 = vpop.f32.mrf.mxu2 }
 0x271   : > { %v992_v18 = vadd.f32 %v1776_v15, %v991_v17  ;;  %v1765_v15 = vld [vmem:[#allocation13 + $0x18] sm:$0xff]  ;;  %v1767_v17 = vld [vmem:[#allocation13 + $0x28] sm:$0xff] }
 0x272   : > { %v1019_v19 = vpop.f32.mrf.mxu3 }
 0x273   : > { %v1020_v20 = vadd.f32 %v1777_v16, %v1019_v19  ;;  %v1030_v21 = vsel %vm1023_vm8, %v992_v18, -inf  ;;  %v1764_v16 = vld [vmem:[#allocation13 + $0x10] sm:$0xff]  ;;  %v1769_v19 = vld [vmem:[#allocation13 + $0x38] sm:$0xff] }
 0x274   : > { %1031 = vmax.xlane.f32.xlu1 %v1030_v21  ;;  %1146 = vmatpush.bf16.xpose.msrb.mxu3 %v1134_v56 }
 0x275   : > { %v1033_v22 = vsel %vm1023_vm8, %v1020_v20, -inf }
 0x276   : > { %1034 = vmax.xlane.f32.xlu2 %v1033_v22 }
 0x278   : > { %v993_v23 = vpop.f32.mrf.mxu2 }
 0x27a   : > { %v1021_v24 = vpop.f32.mrf.mxu3 }
 0x27c   : > { %1250 = vmatpush.bf16.msra.mxu3 %v1765_v15 }
 0x280   : > { %1251 = vmatpush.bf16.msra.mxu3 %v1764_v16 }
 0x2d7   : > { %v1026_v25 = vpop.xlane.xlu2 %1025 }
 0x2d8   : > { %v1036_v26 = vsub.f32 %v936_v5, %v1026_v25 }
 0x2da   : > { %v1040_v27 = vmul.f32 1.442695, %v1036_v26 }
 0x2dc   : > { %1898 = vpow2.f32 %v1040_v27 }
 0x2df   : > { %v1029_v30 = vpop.xlane.xlu2 %1028 }
 0x2e0   : > { %v1037_v31 = vsub.f32 %v964_v9, %v1029_v30 }
 0x2e2   : > { %v1899_v32 = vpop.eup %1898  ;;  %v1042_v33 = vmul.f32 1.442695, %v1037_v31 }
 0x2e3   : > { %v1048_v34 = vsel %vm1023_vm8, %v1899_v32, 0.0 }
 0x2e4   : > { %1900 = vpow2.f32 %v1042_v33  ;;  %1049 = vadd.xlane.f32.xlu2 %v1048_v34 }
 0x2e7   : > { %v1032_v37 = vpop.xlane.xlu1 %1031 }
 0x2e8   : > { %v1038_v38 = vsub.f32 %v992_v18, %v1032_v37  ;;  %v1766_v18 = vld [vmem:[#allocation13 + $0x20] sm:$0xff] }
 0x2e9   : > { %v1035_v39 = vpop.xlane.xlu2 %1034 }
 0x2ea   : > { %v1901_v41 = vpop.eup %1900  ;;  %v1044_v42 = vmul.f32 1.442695, %v1038_v38  ;;  %v1039_v43 = vsub.f32 %v1020_v20, %v1035_v39  ;;  %v1768_v20 = vld [vmem:[#allocation13 + $0x30] sm:$0xff] }
 0x2eb   : > { %v1051_v44 = vsel %vm1023_vm8, %v1901_v41, 0.0 }
 0x2ec   : > { %1902 = vpow2.f32 %v1044_v42  ;;  %1052 = vadd.xlane.f32.xlu0 %v1051_v44  ;;  %v1046_v40 = vmul.f32 1.442695, %v1039_v43  ;;  %v1354_v43 = vld [vmem:[%s2321_s9] sm:$0xff]  ;;  %s2084_s9 = scalar_lea.hbm %s2469_s6, 16 }
 0x2ed   : > { %p2086_p10 = scmp.lt.s32.totalorder %s2084_s9, %s2080_s11 }
 0x2ee   : > { %1904 = vpow2.f32 %v1046_v40 }
 0x2ef   : > { %p2087_p12 = por %p2086_p10, %p2085_p9 }
 0x2f1   : > { %p2088_p13 = pnand %p2087_p12, %p2083_p8 }
 0x2f2   : > { %v1903_v47 = vpop.eup %1902 }
 0x2f3   : > { %v1054_v48 = vsel %vm1023_vm8, %v1903_v47, 0.0 }
 0x2f4   : > { %1055 = vadd.xlane.f32.xlu2 %v1054_v48  ;;  %v1905_v51 = vpop.eup %1904 }
 0x2f5   : > { %v1057_v52 = vsel %vm1023_vm8, %v1905_v51, 0.0 }
 0x2fc   : > { %1058 = vadd.xlane.f32.xlu2 %v1057_v52 }
 0x357   : > { %v1050_v57 = vpop.xlane.xlu2 %1049 }
 0x358   : > { %1906 = vrcp.f32 %v1050_v57 }
 0x35e   : > { %v1907_v58 = vpop.eup %1906 }
 0x35f   : > { %v1064_v59 = vmul.f32 %v1907_v58, %v1899_v32  ;;  %v1053_v60 = vpop.xlane.xlu0 %1052 }
 0x360   : > { %1908 = vrcp.f32 %v1053_v60 }
 0x361   : > { %v1068_v62 = vpack.c.bf16 %v1064_v59, %v1064_v59 }
 0x363   : > { %1654 = vmatmul.msk.bf16.vlgmr.msrb.gmra.mxu2 %vm1023_vm8, %v1068_v62 }
 0x364   : > { %1209 = vmatpush.bf16.xpose.msrb.mxu2 %v1201_v63 }
 0x366   : > { %v1909_v1 = vpop.eup %1908 }
 0x367   : > { %v1065_v2 = vmul.f32 %v1909_v1, %v1901_v41  ;;  %v1056_v3 = vpop.xlane.xlu2 %1055 }
 0x368   : > { %1910 = vrcp.f32 %v1056_v3 }
 0x369   : > { %v1069_v5 = vpack.c.bf16 %v1065_v2, %v1065_v2 }
 0x36b   : > { %1663 = vmatmul.msk.bf16.vlgmr.msrb.gmra.mxu3 %vm1023_vm8, %v1069_v5 }
 0x36c   : > { %1210 = vmatpush.bf16.xpose.msrb.mxu2 %v1198_v6  ;;  %1345 = vmatpush.bf16.msrb.mxu3 %v1769_v19 }
 0x36e   : > { %v1911_v7 = vpop.eup %1910 }
 0x36f   : > { %v1066_v8 = vmul.f32 %v1911_v7, %v1903_v47  ;;  %v1059_v10 = vpop.xlane.xlu2 %1058 }
 0x370   : > { %1912 = vrcp.f32 %v1059_v10  ;;  %1346 = vmatpush.bf16.msrb.mxu3 %v1768_v20 }
 0x371   : > { %v1070_v9 = vpack.c.bf16 %v1066_v8, %v1066_v8 }
 0x373   : > { %1672 = vmatmul.msk.bf16.vlgmr.msra.gmra.mxu2 %vm1023_vm8, %v1070_v9 }
 0x374   : > { %1311 = vmatpush.bf16.msra.mxu2 %v1767_v17 }
 0x376   : > { %v1913_v11 = vpop.eup %1912 }
 0x377   : > { %v1067_v12 = vmul.f32 %v1913_v11, %v1905_v51 }
 0x378   : > { %1312 = vmatpush.bf16.msra.mxu2 %v1766_v18 }
 0x379   : > { %v1071_v13 = vpack.c.bf16 %v1067_v12, %v1067_v12 }
 0x383   : > { %1681 = vmatmul.msk.bf16.vlgmr.msrb.gmra.mxu2 %vm1023_vm8, %v1071_v13 }
 0x3e6   : > { %v1116_v21 = vpop.f32.mrf.mxu2 }
 0x3e7   : > { %v1216_v22 = vpack.c.bf16 %v1116_v21, %v1116_v21 }
 0x3e9   : > { %1699 = vmatmul.msk.bf16.vlgmr.msra.gmra.mxu0 %vm922_vm7, %v1216_v22 }
 0x3ee   : > { %v1118_v23 = vpop.f32.mrf.mxu2  ;;  %v1148_v24 = vpop.f32.mrf.mxu3 }
 0x3ef   : > { %v1217_v25 = vpack.c.bf16 %v1148_v24, %v1148_v24 }
 0x3f1   : > { %1690 = vmatmul.msk.bf16.vlgmr.msra.gmra.mxu3 %vm922_vm7, %v1217_v25 }
 0x3f6   : > { %v1150_v26 = vpop.f32.mrf.mxu3  ;;  %v1180_v27 = vpop.f32.mrf.mxu2 }
 0x3f7   : > { %v1218_v28 = vpack.c.bf16 %v1180_v27, %v1180_v27 }
 0x3f9   : > { %1708 = vmatmul.msk.bf16.vlgmr.msra.gmra.mxu2 %vm922_vm7, %v1218_v28 }
 0x3fe   : > { %v1182_v29 = vpop.f32.mrf.mxu2 }
 0x406   : > { %v1212_v30 = vpop.f32.mrf.mxu2 }
 0x407   : > { %v1219_v31 = vpack.c.bf16 %v1212_v30, %v1212_v30 }
 0x409   : > { %1717 = vmatmul.msk.bf16.vlgmr.msrb.gmra.mxu3 %vm922_vm7, %v1219_v31 }
 0x40e   : > { %v1214_v32 = vpop.f32.mrf.mxu2 }
 0x466   : > { %v1281_v33 = vpop.f32.mrf.mxu0 }
 0x46e   : > { %v1283_v34 = vpop.f32.mrf.mxu0 }
 0x474   : > { %v1253_v35 = vpop.f32.mrf.mxu3 }
 0x475   : > { %v1282_v39 = vadd.f32 %v1281_v33, %v1253_v35 }
 0x47c   : > { %v1255_v36 = vpop.f32.mrf.mxu3  ;;  %v1314_v37 = vpop.f32.mrf.mxu2 }
 0x47d   : > { %v1318_v41 = vadd.f32 %v1314_v37, %v1282_v39 }
 0x484   : > { %v1316_v38 = vpop.f32.mrf.mxu2 }
 0x48c   : > { %v1348_v42 = vpop.f32.mrf.mxu3 }
 0x48d   : > { %v1352_v44 = vadd.f32 %v1348_v42, %v1318_v41 }
 0x48f   : > { %v1355_v45 = vadd.f32 %v1354_v43, %v1352_v44 }
 0x491   : > { %1356 = vst [vmem:[%s348_s18] sm:$0xff] %v1355_v45 }
 0x492   : > { %2091 = shalt.err (!%p2088_p13)
}
 0x493   : > { %1800 = dma.vmem_to_hbm [thread:$0]  (%p2295_p0), %s1372_s27, 128, %s1374_s28, %s1358_s8  }
 0x494   : > { %v1350_v46 = vpop.f32.mrf.mxu3 }
 0x495 PF: > { %s1385_s19 = sand.u32 1, %s2134_s21   ;;  %p1820_p2 = pnand %p1504_p6, %p2302_p5 }
 0x496   : > { %s1386_s13 = scalar_lea.sflag [#allocation7], %s1385_s19 }
 0x497   : > { %p1821_p4 = pneg %p1820_p2 }
 0x499   : > { %2129 = dma.done.wait (%p1821_p4), %s1386_s13, 128  }
 0x49a   : > { %2131 = vsyncadd (%p1821_p4), %s1386_s13, 4294967168  ;;  %s24_s26 = sadd.s32 1, %s2154_s26   ;;  %s2476_s21 = smov %s2138_s22 }
 0x49b   : > { %p21_p7 = scmp.ge.s32.totalorder %s24_s26, 4   ;;  %s2477_s22 = smov %s2142_s23 }
 0x49c   : > { %s2478_s23 = smov %s2300_s16  ;;  %s2479_s24 = smov %s2150_s25 }
 0x49d   : > { %s2480_s25 = smov %s2482_s14  ;;  %23 = sbr.rel (!%p21_p7) target bundleno = 8 (0x8), region = 115 }
 0x4a2   :  { %1392 = vsyncpa [#allocation6], 1 }
 0x4a3   :  { %1394 = vsyncpa [#allocation6 + $0x1], 1 }
 0x4a4   :  { %1395 = vsyncpa [#allocation9], 1 }
 0x4a5   :  { %1396 = vsyncpa [#allocation12], 1 }
 0x4a6   :  { %1397 = vsyncpa [#allocation7], 1 }
 0x4a7   :  { %1399 = vsyncpa [#allocation7 + $0x1], 1 }

</bundles_post_ra>
